<compile_context>
chip_gen: v7x
topology: tpu7x:2x2x1
jax: 0.10.0
libtpu: 0.0.40
codegen_flags: <defaults>
</compile_context>

<pallas_src>
import functools

import numpy as np
import jax
import jax.numpy as jnp
from jax.experimental import pallas as pl
from jax.experimental.pallas import tpu as pltpu

TWO_PI = 2.0 * np.pi
EPS = 1e-6
LANES = 128
SUBLANES = 8
STRIP_ROWS = 512            # 512*128*4B = 256 KiB f32 working set per input


def _round_up(v, m):
    return ((v + m - 1) // m) * m


def _vmem_capacity_bytes():
    """Best-effort physical VMEM query; conservative default if unavailable."""
    try:
        info = pltpu.get_tpu_info()
        for attr in ("vmem_capacity_bytes", "vmem_bytes", "vmem_size_bytes"):
            v = getattr(info, attr, None)
            if v:
                return int(v)
    except Exception:
        pass
    return 64 * 1024 * 1024   # v7x per-TC size: safe lower bound everywhere


_SINGLE_TC_KINDS = ("v2", "v3", "v5e", "v5 lite", "v6e", "v6 lite")


def _default_num_splits():
    """2 on multi-TensorCore devices (v4/v5p/v7x), 1 on single-TC devices."""
    try:
        kind = jax.devices()[0].device_kind.lower()
    except Exception:
        return 2
    if any(s in kind for s in _SINGLE_TC_KINDS):
        return 1
    return 2


def _normal_nll_kernel(x_ref, mu_ref, var_ref, out_ref, *,
                       tile_rows, strip_rows, tiles_per_split,
                       full_rows, tail_lanes):
    """Accumulate per-block partial sums of logli into this split's resident
    (1, 8, 128) f32 output block."""
    c = pl.program_id(0)   # "parallel" axis  (TensorCore split)
    i = pl.program_id(1)   # "arbitrary" axis (row-tile stream; reduction)

    @pl.when(i == 0)
    def _():
        out_ref[...] = jnp.zeros_like(out_ref)

    # Logical first slab-row of this tile.  Deliberately UNclamped: the clamped
    # duplicate tile of an uneven core split lands fully out of range here and
    # therefore masks to zero.  Row indices keep int32 safe to 2^31 rows.
    blk_row0 = (c * tiles_per_split + i) * tile_rows

    n_full = tile_rows // strip_rows
    rem_rows = tile_rows - n_full * strip_rows

    def strip_sum(row_off, n_rows, masked):
        """(8,128) f32 partial sum of logli over rows [row_off, row_off+n_rows)
        of this block."""
        sl = pl.ds(row_off, n_rows)
        x = x_ref[sl, :].astype(jnp.float32)
        mu = mu_ref[sl, :].astype(jnp.float32)
        var = var_ref[sl, :].astype(jnp.float32)
        diff = x - mu
        # Exact divide on purpose (HBM-bound -> VALU/EUP slack).
        # TODO(synk): if a v7x bundle dump shows VALU co-binding, switch to
        # diff*diff * pl.reciprocal(var*2.0 + EPS, approx=True).
        logli = (-0.5 * jnp.log(var * TWO_PI + EPS)
                 - diff * diff / (var * 2.0 + EPS))
        if masked:
            row = (blk_row0 + row_off
                   + jax.lax.broadcasted_iota(jnp.int32, logli.shape, 0))
            col = jax.lax.broadcasted_iota(jnp.int32, logli.shape, 1)
            valid = (row < full_rows) | ((row == full_rows) & (col < tail_lanes))
            # Select, not multiply: block overhang holds stale VMEM that may be
            # NaN/Inf after the log / divide.
            logli = jnp.where(valid, logli, 0.0)
        # (n_rows,128) -> (n_rows//8, 8, 128) is a layout-preserving split of
        # the sublane dim; the axis-0 sum is pure VPU adds across vregs.
        return jnp.sum(logli.reshape(-1, SUBLANES, LANES), axis=0)

    def block_sum(masked):
        acc = jnp.zeros((SUBLANES, LANES), jnp.float32)
        if n_full <= 4:
            for s in range(n_full):            # static unroll for short loops
                acc = acc + strip_sum(s * strip_rows, strip_rows, masked)
        else:
            def body(s, a):
                off = pl.multiple_of(s * strip_rows, strip_rows)
                return a + strip_sum(off, strip_rows, masked)
            acc = jax.lax.fori_loop(0, n_full, body, acc)
        if rem_rows:
            acc = acc + strip_sum(n_full * strip_rows, rem_rows, masked)
        return acc

    fully_valid = (blk_row0 + tile_rows) <= full_rows

    @pl.when(fully_valid)
    def _():
        out_ref[...] += block_sum(masked=False)[None]

    # Only boundary blocks (ragged tail / overhang / clamped duplicate) pay for
    # the iotas + select.
    @pl.when(jnp.logical_not(fully_valid))
    def _():
        out_ref[...] += block_sum(masked=True)[None]


def normal_nll_loss(x, mu, var, *, max_tile_rows=None, num_splits=None,
                    vmem_limit_bytes=None):
    """Pallas implementation of NormalNLLLoss.forward(x, mu, var) -> scalar."""
    n = int(np.prod(x.shape))
    itemsize = jnp.dtype(x.dtype).itemsize
    pad = (-n) % LANES                         # < 128 elements, usually 0

    def _prep(a):
        a = jnp.ravel(a)                       # free for contiguous inputs
        if pad:                                # tiny tail pad only when ragged
            a = jnp.pad(a, (0, pad))
        return a.reshape(-1, LANES)            # free reshape (multiple of 128)

    xf, muf, varf = _prep(x), _prep(mu), _prep(var)
    rows = xf.shape[0]                         # = ceil(n / 128)
    full_rows, tail_lanes = divmod(n, LANES)   # fully valid rows / tail lanes

    # Sub-32-bit dtypes pack along sublanes: keep row counts aligned to the
    # packed-vreg granularity (8 rows f32, 16 bf16, 32 int8/fp8).
    sub_mult = SUBLANES * max(1, 4 // max(1, itemsize))

    # Generation-dependent block size / scoped-VMEM limit.
    if max_tile_rows is None or vmem_limit_bytes is None:
        if _vmem_capacity_bytes() >= 96 * 1024 * 1024:   # v5e/v6e: 128 MiB/TC
            auto_rows, auto_vmem = 16384, 80 * 1024 * 1024   # 8 MiB/input blk
        else:                                            # v7x: 64 MiB/TC
            auto_rows, auto_vmem = 8192, 48 * 1024 * 1024    # 4 MiB/input blk
        if max_tile_rows is None:
            max_tile_rows = auto_rows
        if vmem_limit_bytes is None:
            vmem_limit_bytes = auto_vmem

    tile_rows = min(_round_up(max_tile_rows, sub_mult),
                    _round_up(rows, sub_mult))
    total_tiles = pl.cdiv(rows, tile_rows)

    auto_split = num_splits is None
    if auto_split:
        num_splits = _default_num_splits()
    num_splits = max(1, min(num_splits, total_tiles))
    if (auto_split and num_splits > 1 and total_tiles % num_splits
            and total_tiles < 4 * num_splits):
        # A clamped duplicate tile costs one wasted 3-block DMA; skip the split
        # when that waste would be a large fraction of the total work.
        num_splits = 1
    tiles_per_split = pl.cdiv(total_tiles, num_splits)

    strip_rows = min(STRIP_ROWS, tile_rows)

    def in_map(c, i):
        # Clamp so an uneven split never indexes past the last real tile; the
        # duplicated tile is fully masked to zero inside the kernel.
        return (jnp.minimum(c * tiles_per_split + i, total_tiles - 1), 0)

    kernel = functools.partial(
        _normal_nll_kernel,
        tile_rows=tile_rows, strip_rows=strip_rows,
        tiles_per_split=tiles_per_split,
        full_rows=full_rows, tail_lanes=tail_lanes)

    in_spec = pl.BlockSpec((tile_rows, LANES), in_map)

    cost = pl.CostEstimate(
        flops=8 * n,
        transcendentals=2 * n,                     # log + divide's reciprocal
        bytes_accessed=3 * rows * LANES * itemsize
        + num_splits * SUBLANES * LANES * 4)

    partials = pl.pallas_call(
        kernel,
        out_shape=jax.ShapeDtypeStruct((num_splits, SUBLANES, LANES),
                                       jnp.float32),
        grid_spec=pltpu.PrefetchScalarGridSpec(
            num_scalar_prefetch=0,
            grid=(num_splits, tiles_per_split),
            in_specs=[in_spec, in_spec, in_spec],
            out_specs=pl.BlockSpec((1, SUBLANES, LANES),
                                   lambda c, i: (c, 0, 0)),
        ),
        compiler_params=pltpu.CompilerParams(
            # c: independent per-core partial sums (both TCs stream HBM on
            # multi-TC chips); i: serial reduction stream.
            # TODO(synk): if a v7x trace shows both c values on one core,
            # switch the first axis to pltpu.CORE_PARALLEL.
            dimension_semantics=("parallel", "arbitrary"),
            vmem_limit_bytes=vmem_limit_bytes,
        ),
        cost_estimate=cost,
    )(xf, muf, varf)

    # nll = -logli.sum().mean()   (mean of a scalar == identity)
    return -jnp.sum(partials)


def _reference_nll(x, mu, var):
    x = x.astype(jnp.float32)
    mu = mu.astype(jnp.float32)
    var = var.astype(jnp.float32)
    logli = (-0.5 * jnp.log(var * TWO_PI + EPS)
             - (x - mu) ** 2 / (var * 2.0 + EPS))
    return -jnp.sum(logli)


def _make_inputs(key, shape):
    kx, kmu, kvar = jax.random.split(key, 3)
    x = jax.random.normal(kx, shape, dtype=jnp.float32)
    mu = jax.random.normal(kmu, shape, dtype=jnp.float32)
    # Variance must be positive (as a Q(c|x) variance head would produce).
    var = jax.nn.softplus(jax.random.normal(kvar, shape, dtype=jnp.float32)) + 0.1
    return x, mu, var


if __name__ == "__main__":
    root = jax.random.PRNGKey(0)
    k1, k2, k3, k4 = jax.random.split(root, 4)

    # 1) Small lane-aligned NCHW-like shape (the module is shape-agnostic).
    x, mu, var = _make_inputs(k1, (2, 4, 16, 16))
    nll = jax.block_until_ready(normal_nll_loss(x, mu, var))
    ref = jax.block_until_ready(_reference_nll(x, mu, var))
    np.testing.assert_allclose(np.asarray(nll), np.asarray(ref),
                               rtol=1e-4, atol=1e-2)

    # 2) Lane-unaligned shape: ragged tail mask + fori_loop strips + remainder.
    x2, mu2, var2 = _make_inputs(k2, (4, 8, 129, 130))
    nll2 = jax.block_until_ready(normal_nll_loss(x2, mu2, var2))
    ref2 = jax.block_until_ready(_reference_nll(x2, mu2, var2))
    np.testing.assert_allclose(np.asarray(nll2), np.asarray(ref2),
                               rtol=1e-4, atol=1e-2)

    # 3) Forced tiny tiles + 2-way split with an odd tile count: exercises the
    #    multi-tile stream, clamped duplicate tile, and block overhang mask.
    x3, mu3, var3 = _make_inputs(k3, (3, 5, 33, 47))
    nll3 = jax.block_until_ready(
        normal_nll_loss(x3, mu3, var3, max_tile_rows=64, num_splits=2))
    ref3 = jax.block_until_ready(_reference_nll(x3, mu3, var3))
    np.testing.assert_allclose(np.asarray(nll3), np.asarray(ref3),
                               rtol=1e-4, atol=1e-2)

    # 4) Ragged shape with a partial strip remainder inside a single block.
    x4, mu4, var4 = _make_inputs(k4, (2, 2, 401, 130))
    nll4 = jax.block_until_ready(normal_nll_loss(x4, mu4, var4))
    ref4 = jax.block_until_ready(_reference_nll(x4, mu4, var4))
    np.testing.assert_allclose(np.asarray(nll4), np.asarray(ref4),
                               rtol=1e-4, atol=1e-2)

    print("KERNEL_OK")
</pallas_src>

<mosaic_0001>
module attributes {stable_mosaic.version = 11 : i64} {
  func.func @_normal_nll_kernel(%arg0: i32, %arg1: i32, %arg2: memref<16x128xf32, #tpu.memory_space<vmem>>, %arg3: memref<16x128xf32, #tpu.memory_space<vmem>>, %arg4: memref<16x128xf32, #tpu.memory_space<vmem>>, %arg5: memref<1x8x128xf32, #tpu.memory_space<vmem>>) attributes {dimension_semantics = [#tpu.dimension_semantics<parallel>, #tpu.dimension_semantics<arbitrary>], iteration_bounds = array<i64: 1, 1>, scalar_prefetch = 0 : i64, scratch_operands = 0 : i64, tpu.core_type = #tpu.core_type<tc>, window_params = [{transform_indices = @transform_0, window_bounds = array<i64: 16, 128>}, {transform_indices = @transform_1, window_bounds = array<i64: 16, 128>}, {transform_indices = @transform_2, window_bounds = array<i64: 16, 128>}, {transform_indices = @transform_3, window_bounds = array<i64: 1, 8, 128>}]} {
    %c0_i32 = arith.constant 0 : i32
    %0 = arith.cmpi eq, %arg1, %c0_i32 : i32
    %1 = arith.extui %0 : i1 to i32
    %c0_i32_0 = arith.constant 0 : i32
    %2 = arith.cmpi ne, %1, %c0_i32_0 : i32
    scf.if %2 {
      %cst = arith.constant 0.000000e+00 : f32
      %13 = vector.broadcast %cst : f32 to vector<1x8x128xf32>
      %c0 = arith.constant 0 : index
      %c0_5 = arith.constant 0 : index
      %c0_6 = arith.constant 0 : index
      %14 = vector.load %arg5[%c0, %c0_5, %c0_6] : memref<1x8x128xf32, #tpu.memory_space<vmem>>, vector<1x8x128xf32>
      tpu.vector_store %arg5[%c0, %c0_5, %c0_6], %13 {strides = array<i32>} : memref<1x8x128xf32, #tpu.memory_space<vmem>>, vector<1x8x128xf32>,
    } else {
    }
    %c1_i32 = arith.constant 1 : i32
    %3 = arith.muli %arg0, %c1_i32 : i32
    %4 = arith.addi %3, %arg1 : i32
    %c16_i32 = arith.constant 16 : i32
    %5 = arith.muli %4, %c16_i32 : i32
    %c16_i32_1 = arith.constant 16 : i32
    %6 = arith.addi %5, %c16_i32_1 : i32
    %c16_i32_2 = arith.constant 16 : i32
    %7 = arith.cmpi sle, %6, %c16_i32_2 : i32
    %8 = arith.extui %7 : i1 to i32
    %c0_i32_3 = arith.constant 0 : i32
    %9 = arith.cmpi ne, %8, %c0_i32_3 : i32
    scf.if %9 {
      %c0 = arith.constant 0 : index
      %c0_5 = arith.constant 0 : index
      %c0_6 = arith.constant 0 : index
      %13 = vector.load %arg5[%c0, %c0_5, %c0_6] : memref<1x8x128xf32, #tpu.memory_space<vmem>>, vector<1x8x128xf32>
      %cst = arith.constant 0.000000e+00 : f32
      %14 = vector.broadcast %cst : f32 to vector<8x128xf32>
      %c0_7 = arith.constant 0 : index
      %c0_8 = arith.constant 0 : index
      %15 = vector.load %arg2[%c0_7, %c0_8] : memref<16x128xf32, #tpu.memory_space<vmem>>, vector<16x128xf32>
      %c0_9 = arith.constant 0 : index
      %c0_10 = arith.constant 0 : index
      %16 = vector.load %arg3[%c0_9, %c0_10] : memref<16x128xf32, #tpu.memory_space<vmem>>, vector<16x128xf32>
      %c0_11 = arith.constant 0 : index
      %c0_12 = arith.constant 0 : index
      %17 = vector.load %arg4[%c0_11, %c0_12] : memref<16x128xf32, #tpu.memory_space<vmem>>, vector<16x128xf32>
      %18 = arith.subf %15, %16 : vector<16x128xf32>
      %cst_13 = arith.constant 6.28318548 : f32
      %19 = vector.broadcast %cst_13 : f32 to vector<16x128xf32>
      %20 = arith.mulf %17, %19 : vector<16x128xf32>
      %cst_14 = arith.constant 9.99999997E-7 : f32
      %21 = vector.broadcast %cst_14 : f32 to vector<16x128xf32>
      %22 = arith.addf %20, %21 : vector<16x128xf32>
      %23 = math.log %22 : vector<16x128xf32>
      %cst_15 = arith.constant -5.000000e-01 : f32
      %24 = vector.broadcast %cst_15 : f32 to vector<16x128xf32>
      %25 = arith.mulf %24, %23 : vector<16x128xf32>
      %26 = arith.mulf %18, %18 : vector<16x128xf32>
      %cst_16 = arith.constant 2.000000e+00 : f32
      %27 = vector.broadcast %cst_16 : f32 to vector<16x128xf32>
      %28 = arith.mulf %17, %27 : vector<16x128xf32>
      %cst_17 = arith.constant 9.99999997E-7 : f32
      %29 = vector.broadcast %cst_17 : f32 to vector<16x128xf32>
      %30 = arith.addf %28, %29 : vector<16x128xf32>
      %31 = arith.divf %26, %30 : vector<16x128xf32>
      %32 = arith.subf %25, %31 : vector<16x128xf32>
      %33 = vector.shape_cast %32 : vector<16x128xf32> to vector<2x8x128xf32>
      %cst_18 = arith.constant dense<0.000000e+00> : vector<8x128xf32>
      %34 = vector.multi_reduction <add>, %33, %cst_18 [0] : vector<2x8x128xf32> to vector<8x128xf32>
      %35 = arith.addf %14, %34 : vector<8x128xf32>
      %36 = vector.shape_cast %35 : vector<8x128xf32> to vector<1x8x128xf32>
      %37 = arith.addf %13, %36 : vector<1x8x128xf32>
      %c0_19 = arith.constant 0 : index
      %c0_20 = arith.constant 0 : index
      %c0_21 = arith.constant 0 : index
      %38 = vector.load %arg5[%c0_19, %c0_20, %c0_21] : memref<1x8x128xf32, #tpu.memory_space<vmem>>, vector<1x8x128xf32>
      tpu.vector_store %arg5[%c0_19, %c0_20, %c0_21], %37 {strides = array<i32>} : memref<1x8x128xf32, #tpu.memory_space<vmem>>, vector<1x8x128xf32>,
    } else {
    }
    %true = arith.constant true
    %10 = arith.xori %7, %true : i1
    %11 = arith.extui %10 : i1 to i32
    %c0_i32_4 = arith.constant 0 : i32
    %12 = arith.cmpi ne, %11, %c0_i32_4 : i32
    scf.if %12 {
      %c0 = arith.constant 0 : index
      %c0_5 = arith.constant 0 : index
      %c0_6 = arith.constant 0 : index
      %13 = vector.load %arg5[%c0, %c0_5, %c0_6] : memref<1x8x128xf32, #tpu.memory_space<vmem>>, vector<1x8x128xf32>
      %cst = arith.constant 0.000000e+00 : f32
      %14 = vector.broadcast %cst : f32 to vector<8x128xf32>
      %c0_7 = arith.constant 0 : index
      %c0_8 = arith.constant 0 : index
      %15 = vector.load %arg2[%c0_7, %c0_8] : memref<16x128xf32, #tpu.memory_space<vmem>>, vector<16x128xf32>
      %c0_9 = arith.constant 0 : index
      %c0_10 = arith.constant 0 : index
      %16 = vector.load %arg3[%c0_9, %c0_10] : memref<16x128xf32, #tpu.memory_space<vmem>>, vector<16x128xf32>
      %c0_11 = arith.constant 0 : index
      %c0_12 = arith.constant 0 : index
      %17 = vector.load %arg4[%c0_11, %c0_12] : memref<16x128xf32, #tpu.memory_space<vmem>>, vector<16x128xf32>
      %18 = arith.subf %15, %16 : vector<16x128xf32>
      %cst_13 = arith.constant 6.28318548 : f32
      %19 = vector.broadcast %cst_13 : f32 to vector<16x128xf32>
      %20 = arith.mulf %17, %19 : vector<16x128xf32>
      %cst_14 = arith.constant 9.99999997E-7 : f32
      %21 = vector.broadcast %cst_14 : f32 to vector<16x128xf32>
      %22 = arith.addf %20, %21 : vector<16x128xf32>
      %23 = math.log %22 : vector<16x128xf32>
      %cst_15 = arith.constant -5.000000e-01 : f32
      %24 = vector.broadcast %cst_15 : f32 to vector<16x128xf32>
      %25 = arith.mulf %24, %23 : vector<16x128xf32>
      %26 = arith.mulf %18, %18 : vector<16x128xf32>
      %cst_16 = arith.constant 2.000000e+00 : f32
      %27 = vector.broadcast %cst_16 : f32 to vector<16x128xf32>
      %28 = arith.mulf %17, %27 : vector<16x128xf32>
      %cst_17 = arith.constant 9.99999997E-7 : f32
      %29 = vector.broadcast %cst_17 : f32 to vector<16x128xf32>
      %30 = arith.addf %28, %29 : vector<16x128xf32>
      %31 = arith.divf %26, %30 : vector<16x128xf32>
      %32 = arith.subf %25, %31 : vector<16x128xf32>
      %c0_i32_18 = arith.constant 0 : i32
      %33 = arith.addi %5, %c0_i32_18 : i32
      %34 = tpu.iota {dimensions = array<i32: 0>} : vector<16x128xi32>
      %35 = vector.broadcast %33 : i32 to vector<16x128xi32>
      %36 = arith.addi %35, %34 : vector<16x128xi32>
      %37 = tpu.iota {dimensions = array<i32: 1>} : vector<16x128xi32>
      %c16_i32_19 = arith.constant 16 : i32
      %38 = vector.broadcast %c16_i32_19 : i32 to vector<16x128xi32>
      %39 = arith.cmpi slt, %36, %38 : vector<16x128xi32>
      %c16_i32_20 = arith.constant 16 : i32
      %40 = vector.broadcast %c16_i32_20 : i32 to vector<16x128xi32>
      %41 = arith.cmpi eq, %36, %40 : vector<16x128xi32>
      %c0_i32_21 = arith.constant 0 : i32
      %42 = vector.broadcast %c0_i32_21 : i32 to vector<16x128xi32>
      %43 = arith.cmpi slt, %37, %42 : vector<16x128xi32>
      %44 = arith.andi %41, %43 : vector<16x128xi1>
      %45 = arith.ori %39, %44 : vector<16x128xi1>
      %cst_22 = arith.constant 0.000000e+00 : f32
      %46 = vector.broadcast %cst_22 : f32 to vector<16x128xf32>
      %47 = arith.select %45, %32, %46 : vector<16x128xi1>, vector<16x128xf32>
      %48 = vector.shape_cast %47 : vector<16x128xf32> to vector<2x8x128xf32>
      %cst_23 = arith.constant dense<0.000000e+00> : vector<8x128xf32>
      %49 = vector.multi_reduction <add>, %48, %cst_23 [0] : vector<2x8x128xf32> to vector<8x128xf32>
      %50 = arith.addf %14, %49 : vector<8x128xf32>
      %51 = vector.shape_cast %50 : vector<8x128xf32> to vector<1x8x128xf32>
      %52 = arith.addf %13, %51 : vector<1x8x128xf32>
      %c0_24 = arith.constant 0 : index
      %c0_25 = arith.constant 0 : index
      %c0_26 = arith.constant 0 : index
      %53 = vector.load %arg5[%c0_24, %c0_25, %c0_26] : memref<1x8x128xf32, #tpu.memory_space<vmem>>, vector<1x8x128xf32>
      tpu.vector_store %arg5[%c0_24, %c0_25, %c0_26], %52 {strides = array<i32>} : memref<1x8x128xf32, #tpu.memory_space<vmem>>, vector<1x8x128xf32>,
    } else {
    }
    return
  }
  func.func @transform_0(%arg0: i32, %arg1: i32) -> (i32, i32) {
    %c1_i32 = arith.constant 1 : i32
    %0 = arith.muli %arg0, %c1_i32 : i32
    %1 = arith.addi %0, %arg1 : i32
    %c0_i32 = arith.constant 0 : i32
    %2 = arith.minsi %1, %c0_i32 : i32
    %c0_i32_0 = arith.constant 0 : i32
    %c0_i32_1 = arith.constant 0 : i32
    return %2, %c0_i32_0 : i32, i32
  }
  func.func @transform_1(%arg0: i32, %arg1: i32) -> (i32, i32) {
    %c1_i32 = arith.constant 1 : i32
    %0 = arith.muli %arg0, %c1_i32 : i32
    %1 = arith.addi %0, %arg1 : i32
    %c0_i32 = arith.constant 0 : i32
    %2 = arith.minsi %1, %c0_i32 : i32
    %c0_i32_0 = arith.constant 0 : i32
    %c0_i32_1 = arith.constant 0 : i32
    return %2, %c0_i32_0 : i32, i32
  }
  func.func @transform_2(%arg0: i32, %arg1: i32) -> (i32, i32) {
    %c1_i32 = arith.constant 1 : i32
    %0 = arith.muli %arg0, %c1_i32 : i32
    %1 = arith.addi %0, %arg1 : i32
    %c0_i32 = arith.constant 0 : i32
    %2 = arith.minsi %1, %c0_i32 : i32
    %c0_i32_0 = arith.constant 0 : i32
    %c0_i32_1 = arith.constant 0 : i32
    return %2, %c0_i32_0 : i32, i32
  }
  func.func @transform_3(%arg0: i32, %arg1: i32) -> (i32, i32, i32) {
    %c0_i32 = arith.constant 0 : i32
    %c0_i32_0 = arith.constant 0 : i32
    %c0_i32_1 = arith.constant 0 : i32
    return %arg0, %c0_i32, %c0_i32_0 : i32, i32, i32
  }
}

</mosaic_0001>

<bundles_post_ra>
// kernel: tpu_custom_call.1
= control target key start
LH: loop header
LB: loop body
LE: loop exit
PB: predicated region body
PF: predicated region fallthrough
CT: control target
= control target key end

     0   :  { %8 = vsyncpa [#allocation3], 0  ;;  %s412_s0 = inlined_call_operand.hbm [shape: f32[16,128], index: 0, kind: input, shape index: {}]   ;;  %s413_s1 = inlined_call_operand.hbm [shape: f32[16,128], index: 1, kind: input, shape index: {}]   ;;  %s414_s2 = inlined_call_operand.hbm [shape: f32[16,128], index: 2, kind: input, shape index: {}]   ;;  %s415_s3 = inlined_call_operand.hbm [shape: f32[1,8,128], index: 3, kind: output, shape index: {}]  }
   0x1   :  { %9 = vsyncpa [#allocation6], 0 }
   0x2   :  { %10 = vsyncpa [#allocation4], 0  ;;  %s322_s12 = smov [#allocation5]   ;;  %s323_s14 = smov [#allocation2]  }
   0x3   :  { %s40_s13 = sshll.u32 %s322_s12, 4  ;;  %s22_s15 = sshll.u32 %s323_s14, 4  ;;  %s41_s13 = int_to_ptr.vmem [resolvable:$true] %s40_s13  ;;  %s348_s15 = int_to_ptr.vmem [resolvable:$true] %s22_s15 }
   0x4   :  { %s228_s18 = scalar_lea.hbm %s413_s1, 256 }
   0x5   :  { %p229_p0 = scmp.ne.s32.totalorder %s413_s1, %s228_s18  ;;  %p232_p1 = scmp.lt.u32.totalorder %s228_s18, %s413_s1 }
   0x7   :  { %p234_p2 = pnand %p232_p1, %p229_p0 }
   0x9   :  { %237 = shalt.err (!%p234_p2)
}
   0xa   :  { %s238_s23 = scalar_lea.vmem %s41_s13, 256  ;;  %p243_p4 = scmp.lt.s32.totalorder %s41_s13, %s41_s13 }
   0xb   :  { %p239_p3 = scmp.ne.s32.totalorder %s41_s13, %s238_s23  ;;  %p244_p5 = scmp.lt.s32.totalorder %s238_s23, %s238_s23 }
   0xd   :  { %p245_p6 = por %p244_p5, %p243_p4 }
   0xf   :  { %p246_p7 = pnand %p245_p6, %p239_p3 }
  0x11   :  { %249 = shalt.err (!%p246_p7)
}
  0x12   :  { %s324_s24 = smov 128   ;;  %s325_s25 = smov 8  }
  0x13   :  { %46 = dma.hbm_to_vmem [thread:$0]  %s413_s1, 256, %s41_s13, [#allocation6], %s324_s24, %s324_s24, %s325_s25  }
  0x14   :  { %s250_s30 = scalar_lea.hbm %s412_s0, 256 }
  0x15   :  { %p251_p8 = scmp.ne.s32.totalorder %s412_s0, %s250_s30  ;;  %p254_p9 = scmp.lt.u32.totalorder %s250_s30, %s412_s0 }
  0x17   :  { %p256_p10 = pnand %p254_p9, %p251_p8 }
  0x19   :  { %259 = shalt.err (!%p256_p10)
}
  0x1a   :  { %s260_s8 = scalar_lea.vmem %s348_s15, 256  ;;  %p265_p12 = scmp.lt.s32.totalorder %s348_s15, %s348_s15 }
  0x1b   :  { %p261_p11 = scmp.ne.s32.totalorder %s348_s15, %s260_s8  ;;  %p266_p13 = scmp.lt.s32.totalorder %s260_s8, %s260_s8 }
  0x1d   :  { %p267_p0 = por %p266_p13, %p265_p12 }
  0x1f   :  { %p268_p1 = pnand %p267_p0, %p261_p11 }
  0x21   :  { %271 = shalt.err (!%p268_p1)
}
  0x22   :  { %28 = dma.hbm_to_vmem [thread:$0]  %s412_s0, 256, %s348_s15, [#allocation3], %s324_s24, %s324_s24, %s325_s25  }
  0x23   :  { %s326_s10 = smov [#allocation7]   ;;  %s272_s14 = scalar_lea.hbm %s414_s2, 256 }
  0x24   :  { %s58_s11 = sshll.u32 %s326_s10, 4  ;;  %p273_p2 = scmp.ne.s32.totalorder %s414_s2, %s272_s14  ;;  %s59_s11 = int_to_ptr.vmem [resolvable:$true] %s58_s11 }
  0x25   :  { %p276_p3 = scmp.lt.u32.totalorder %s272_s14, %s414_s2 }
  0x27   :  { %p278_p4 = pnand %p276_p3, %p273_p2 }
  0x29   :  { %281 = shalt.err (!%p278_p4)
}
  0x2a   :  { %s282_s20 = scalar_lea.vmem %s59_s11, 256  ;;  %p287_p6 = scmp.lt.s32.totalorder %s59_s11, %s59_s11 }
  0x2b   :  { %p283_p5 = scmp.ne.s32.totalorder %s59_s11, %s282_s20  ;;  %p288_p7 = scmp.lt.s32.totalorder %s282_s20, %s282_s20 }
  0x2d   :  { %p289_p8 = por %p288_p7, %p287_p6 }
  0x2f   :  { %p290_p9 = pnand %p289_p8, %p283_p5 }
  0x31   :  { %293 = shalt.err (!%p290_p9)
}
  0x32   :  { %64 = dma.hbm_to_vmem [thread:$0]  %s414_s2, 256, %s59_s11, [#allocation6], %s324_s24, %s324_s24, %s325_s25  }
  0x33   :  { %316 = dma.done.wait [#allocation3], 256  }
  0x34   :  { %317 = vsyncadd [#allocation3], 4294967040 }
  0x35   :  { %318 = dma.done.wait [#allocation6], 512  }
  0x36   :  { %319 = vsyncadd [#allocation6], 4294966784  ;;  %v103_v0 = vld [vmem:[#allocation7] sm:$0xff]  ;;  %v104_v1 = vld [vmem:[#allocation7 + $0x8] sm:$0xff]  ;;  %s327_s2 = smov [#allocation8]  }
  0x37   :  { %v107_v2 = vmul.f32 6.2831855, %v103_v0  ;;  %v108_v3 = vmul.f32 6.2831855, %v104_v1  ;;  %v119_v4 = vmul.f32 2.0, %v103_v0  ;;  %v120_v5 = vmul.f32 2.0, %v104_v1 }
  0x38   :  { %v99_v10 = vld [vmem:[#allocation2] sm:$0xff]  ;;  %v101_v11 = vld [vmem:[#allocation5] sm:$0xff]  ;;  %v100_v12 = vld [vmem:[#allocation2 + $0x8] sm:$0xff]  ;;  %s197_s21 = sshll.u32 %s327_s2, 4  ;;  %s198_s21 = int_to_ptr.vmem [resolvable:$true] %s197_s21 }
  0x39   :  { %v109_v6 = vadd.f32 1e-06, %v107_v2  ;;  %v110_v7 = vadd.f32 1e-06, %v108_v3  ;;  %v121_v8 = vadd.f32 1e-06, %v119_v4  ;;  %v105_v14 = vsub.f32 %v99_v10, %v101_v11  ;;  %p299_p11 = scmp.lt.s32.totalorder %s198_s21, %s198_s21 }
  0x3a   :  { %v122_v9 = vadd.f32 1e-06, %v120_v5  ;;  %v102_v13 = vld [vmem:[#allocation5 + $0x8] sm:$0xff]  ;;  %s294_s22 = scalar_lea.vmem %s198_s21, 128 }
  0x3b   :  { %220 = vlog2.f32 %v109_v6  ;;  %v106_v15 = vsub.f32 %v100_v12, %v102_v13  ;;  %v117_v16 = vmul.f32 %v105_v14, %v105_v14  ;;  %p295_p10 = scmp.ne.s32.totalorder %s198_s21, %s294_s22  ;;  %p300_p12 = scmp.lt.s32.totalorder %s294_s22, %s294_s22 }
  0x3c   :  { %222 = vlog2.f32 %v110_v7 }
  0x3d   :  { %224 = vrcp.f32 %v121_v8  ;;  %v118_v18 = vmul.f32 %v106_v15, %v106_v15  ;;  %p301_p13 = por %p300_p12, %p299_p11 }
  0x3e   :  { %226 = vrcp.f32 %v122_v9 }
  0x3f   :  { %p302_p0 = pnand %p301_p13, %p295_p10 }
  0x45   :  { %v221_v17 = vpop.eup %220 }
  0x46   :  { %v223_v19 = vpop.eup %222  ;;  %v112_v20 = vmul.f32 0.6931472, %v221_v17 }
  0x47   :  { %v225_v21 = vpop.eup %224  ;;  %v114_v22 = vmul.f32 0.6931472, %v223_v19 }
  0x48   :  { %v227_v23 = vpop.eup %226  ;;  %v115_v24 = vmul.f32 -0.5, %v112_v20  ;;  %v124_v25 = vmul.f32 %v225_v21, %v117_v16 }
  0x49   :  { %v116_v26 = vmul.f32 -0.5, %v114_v22  ;;  %v126_v27 = vmul.f32 %v227_v23, %v118_v18 }
  0x4a   :  { %v127_v28 = vsub.f32 %v115_v24, %v124_v25 }
  0x4b   :  { %v128_v29 = vsub.f32 %v116_v26, %v126_v27 }
  0x4d   :  { %v129_v30 = vadd.f32 %v128_v29, %v127_v28 }
  0x4f   :  { %132 = vst [vmem:[#allocation8] sm:$0xff] %v129_v30 }
  0x50   :  { %305 = shalt.err (!%p302_p0)
}
  0x51   :  { %s306_s25 = scalar_lea.hbm %s415_s3, 128 }
  0x52   :  { %p307_p1 = scmp.ne.s32.totalorder %s415_s3, %s306_s25  ;;  %p310_p2 = scmp.lt.u32.totalorder %s306_s25, %s415_s3 }
  0x54   :  { %p312_p3 = pnand %p310_p2, %p307_p1 }
  0x56   :  { %315 = shalt.err (!%p312_p3)
}
  0x57   :  { %200 = dma.vmem_to_hbm [thread:$0]  %s198_s21, 128, %s415_s3, [#allocation4]  }
  0x58   :  { %320 = dma.done.wait [#allocation4], 128  }
  0x59   :  { %321 = vsyncadd [#allocation4], 4294967168 }
  0x5a   :  { %204 = vsyncpa [#allocation3], 1 }
  0x5b   :  { %205 = vsyncpa [#allocation6], 1 }
  0x5c   :  { %206 = vsyncpa [#allocation4], 1 }

</bundles_post_ra>
